<compile_context>
chip_gen: v7x
topology: tpu7x:2x2x1
jax: 0.10.0
libtpu: 0.0.40
codegen_flags: <defaults>
</compile_context>

<pallas_src>
import jax
import jax.numpy as jnp
from jax.experimental import pallas as pl
from jax.experimental.pallas import tpu as pltpu

HIDDEN = 20
NUM_LAYERS = 4          # number of hidden Linear+Tanh blocks
OUT_DIM = 8
IN_DIM = 1


def _mlp_kernel(t_ref,
                w1_ref, b1_ref,
                w2_ref, b2_ref,
                w3_ref, b3_ref,
                w4_ref, b4_ref,
                w5_ref, b5_ref,
                o_ref):
    """Fused, transposed MLP forward for one batch tile (batch on lanes).

    t_ref : (1, TM)        input time samples for this tile
    wN    : (out, in)      torch nn.Linear weight layout
    bN    : (out, 1)       bias as a column (broadcast along lanes)
    o_ref : (OUT_DIM, TM)  network output for this tile
    """
    x = t_ref[...]                                             # (1, TM)

    # Layer 1: Linear(1 -> 20).  K=1 contraction == outer product; keep it on
    # the VPU as a broadcast multiply (frees the MXU / vector-extended slot).
    h = jnp.tanh(w1_ref[...] * x + b1_ref[...])                # (H, TM)

    # Hidden layers on the MXU: (H, H) @ (H, TM).
    h = jnp.tanh(jnp.dot(w2_ref[...], h,
                         preferred_element_type=jnp.float32) + b2_ref[...])
    h = jnp.tanh(jnp.dot(w3_ref[...], h,
                         preferred_element_type=jnp.float32) + b3_ref[...])
    h = jnp.tanh(jnp.dot(w4_ref[...], h,
                         preferred_element_type=jnp.float32) + b4_ref[...])

    # Output layer: Linear(20 -> 8), no activation.
    out = jnp.dot(w5_ref[...], h,
                  preferred_element_type=jnp.float32) + b5_ref[...]
    o_ref[...] = out.astype(o_ref.dtype)                       # (OUT_DIM, TM)


def state_nn_forward(t, params, *, tm=512):
    """Run the StateNN MLP with a single fused Pallas kernel.

    t      : (N, 1) float32  (any N; wrapper pads to a multiple of `tm`)
    params : dict with w1..w5 of shape (out, in) and b1..b5 of shape (out,)
             (torch nn.Linear layout).
    tm     : batch tile size; must be a multiple of 128 (lane width).
    Returns (N, 8) float32.
    """
    N = t.shape[0]
    assert t.shape == (N, 1)
    assert tm % 128 == 0, "tile must be a multiple of 128 (lane width)"

    # Batch on lanes: present t as a (1, N_pad) row vector.
    n_pad = max(pl.cdiv(N, tm), 1) * tm
    t_row = jnp.zeros((1, n_pad), jnp.float32).at[0, :N].set(t[:, 0])

    weight_args = []
    for i in range(1, NUM_LAYERS + 2):
        w = params[f"w{i}"].astype(jnp.float32)                # (out, in)
        b = params[f"b{i}"].astype(jnp.float32).reshape(-1, 1)  # (out, 1)
        weight_args += [w, b]

    # Full-array BlockSpec for every weight / bias (tiny; constant block index
    # keeps them resident in VMEM across all grid steps).
    def full_spec(arr):
        return pl.BlockSpec(arr.shape, lambda i: (0, 0))

    grid_spec = pltpu.PrefetchScalarGridSpec(
        num_scalar_prefetch=0,
        grid=(n_pad // tm,),
        in_specs=[pl.BlockSpec((1, tm), lambda i: (0, i))] +
                 [full_spec(a) for a in weight_args],
        out_specs=pl.BlockSpec((OUT_DIM, tm), lambda i: (0, i)),
    )

    out_t = pl.pallas_call(
        _mlp_kernel,
        out_shape=jax.ShapeDtypeStruct((OUT_DIM, n_pad), jnp.float32),
        grid_spec=grid_spec,
        compiler_params=pltpu.CompilerParams(
            dimension_semantics=("parallel",)),
    )(t_row, *weight_args)

    # Drop batch padding, transpose back to the torch-style (N, 8) layout.
    return out_t[:, :N].T


def init_state_nn_params(seed=42):
    """Deterministic Xavier-uniform init (tanh gain = 5/3), bias = 0.01,
    mirroring StateNN.init_xavier (shapes only; synthetic weights).
    Weights use the torch nn.Linear layout (out_features, in_features)."""
    key = jax.random.PRNGKey(seed)
    gain = 5.0 / 3.0  # nn.init.calculate_gain('tanh')

    dims = [(IN_DIM, HIDDEN)]
    dims += [(HIDDEN, HIDDEN)] * (NUM_LAYERS - 1)
    dims += [(HIDDEN, OUT_DIM)]

    params = {}
    for idx, (fan_in, fan_out) in enumerate(dims, start=1):
        key, sub = jax.random.split(key)
        bound = gain * jnp.sqrt(6.0 / (fan_in + fan_out))
        w = jax.random.uniform(sub, (fan_out, fan_in),
                               minval=-bound, maxval=bound, dtype=jnp.float32)
        b = jnp.full((fan_out,), 0.01, dtype=jnp.float32)
        params[f"w{idx}"] = w
        params[f"b{idx}"] = b
    return params


def state_nn_forward_ref(t, params):
    """Pure-JAX reference (y = x @ W.T + b, torch semantics)."""
    h = t
    for idx in range(1, NUM_LAYERS + 1):
        h = jnp.tanh(h @ params[f"w{idx}"].T + params[f"b{idx}"])
    last = NUM_LAYERS + 1
    return h @ params[f"w{last}"].T + params[f"b{last}"]


if __name__ == "__main__":
    params = init_state_nn_params(seed=42)
    key = jax.random.PRNGKey(0)

    ok = True
    # Two batch sizes: one that exactly tiles (2 parallel grid steps -> feeds
    # both v7x TensorCores) and one ragged size that exercises the padding path
    # (similar scale to the ~250-day COVID time series of the original script).
    for N in (1024, 250):
        # normalized "time" in (0, 1] plus a small deterministic perturbation
        key, sub = jax.random.split(key)
        t_in = (jnp.arange(1, N + 1, dtype=jnp.float32).reshape(-1, 1) / N
                + 0.01 * jax.random.normal(sub, (N, 1), dtype=jnp.float32))

        out = state_nn_forward(t_in, params, tm=512)
        out = jax.block_until_ready(out)

        ref = state_nn_forward_ref(t_in, params)
        ok &= (out.shape == (N, OUT_DIM))
        ok &= bool(jnp.allclose(out, ref, atol=1e-4, rtol=1e-4))

    assert ok, "mismatch vs JAX reference"
    print("KERNEL_OK")
</pallas_src>

<mosaic_0001>
module attributes {stable_mosaic.version = 11 : i64} {
  func.func @_mlp_kernel(%arg0: i32, %arg1: memref<1x512xf32, #tpu.memory_space<vmem>>, %arg2: memref<20x1xf32, #tpu.memory_space<vmem>>, %arg3: memref<20x1xf32, #tpu.memory_space<vmem>>, %arg4: memref<20x20xf32, #tpu.memory_space<vmem>>, %arg5: memref<20x1xf32, #tpu.memory_space<vmem>>, %arg6: memref<20x20xf32, #tpu.memory_space<vmem>>, %arg7: memref<20x1xf32, #tpu.memory_space<vmem>>, %arg8: memref<20x20xf32, #tpu.memory_space<vmem>>, %arg9: memref<20x1xf32, #tpu.memory_space<vmem>>, %arg10: memref<8x20xf32, #tpu.memory_space<vmem>>, %arg11: memref<8x1xf32, #tpu.memory_space<vmem>>, %arg12: memref<8x512xf32, #tpu.memory_space<vmem>>) attributes {dimension_semantics = [#tpu.dimension_semantics<parallel>], iteration_bounds = array<i64: 2>, scalar_prefetch = 0 : i64, scratch_operands = 0 : i64, tpu.core_type = #tpu.core_type<tc>, window_params = [{transform_indices = @transform_0, window_bounds = array<i64: 1, 512>}, {pipeline_mode = #tpu.pipeline_mode<synchronous>, transform_indices = @transform_1, window_bounds = array<i64: 20, 1>}, {pipeline_mode = #tpu.pipeline_mode<synchronous>, transform_indices = @transform_2, window_bounds = array<i64: 20, 1>}, {pipeline_mode = #tpu.pipeline_mode<synchronous>, transform_indices = @transform_3, window_bounds = array<i64: 20, 20>}, {pipeline_mode = #tpu.pipeline_mode<synchronous>, transform_indices = @transform_4, window_bounds = array<i64: 20, 1>}, {pipeline_mode = #tpu.pipeline_mode<synchronous>, transform_indices = @transform_5, window_bounds = array<i64: 20, 20>}, {pipeline_mode = #tpu.pipeline_mode<synchronous>, transform_indices = @transform_6, window_bounds = array<i64: 20, 1>}, {pipeline_mode = #tpu.pipeline_mode<synchronous>, transform_indices = @transform_7, window_bounds = array<i64: 20, 20>}, {pipeline_mode = #tpu.pipeline_mode<synchronous>, transform_indices = @transform_8, window_bounds = array<i64: 20, 1>}, {pipeline_mode = #tpu.pipeline_mode<synchronous>, transform_indices = @transform_9, window_bounds = array<i64: 8, 20>}, {pipeline_mode = #tpu.pipeline_mode<synchronous>, transform_indices = @transform_10, window_bounds = array<i64: 8, 1>}, {transform_indices = @transform_11, window_bounds = array<i64: 8, 512>}]} {
    %c0 = arith.constant 0 : index
    %c0_0 = arith.constant 0 : index
    %0 = vector.load %arg1[%c0, %c0_0] : memref<1x512xf32, #tpu.memory_space<vmem>>, vector<1x512xf32>
    %c0_1 = arith.constant 0 : index
    %c0_2 = arith.constant 0 : index
    %1 = vector.load %arg2[%c0_1, %c0_2] : memref<20x1xf32, #tpu.memory_space<vmem>>, vector<20x1xf32>
    %2 = vector.broadcast %1 : vector<20x1xf32> to vector<20x512xf32>
    %3 = vector.broadcast %0 : vector<1x512xf32> to vector<20x512xf32>
    %4 = arith.mulf %2, %3 : vector<20x512xf32>
    %c0_3 = arith.constant 0 : index
    %c0_4 = arith.constant 0 : index
    %5 = vector.load %arg3[%c0_3, %c0_4] : memref<20x1xf32, #tpu.memory_space<vmem>>, vector<20x1xf32>
    %6 = vector.broadcast %5 : vector<20x1xf32> to vector<20x512xf32>
    %7 = arith.addf %4, %6 : vector<20x512xf32>
    %8 = math.tanh %7 : vector<20x512xf32>
    %c0_5 = arith.constant 0 : index
    %c0_6 = arith.constant 0 : index
    %9 = vector.load %arg4[%c0_5, %c0_6] : memref<20x20xf32, #tpu.memory_space<vmem>>, vector<20x20xf32>
    %cst = arith.constant dense<0.000000e+00> : vector<20x512xf32>
    %10 = tpu.matmul %9, %8, %cst {dimension_numbers = #tpu.dot_dimension_numbers<[1], [0], [0], [1], [0, 0, 1, 1], [], []>} : vector<20x20xf32>, vector<20x512xf32>, vector<20x512xf32> -> vector<20x512xf32>
    %c0_7 = arith.constant 0 : index
    %c0_8 = arith.constant 0 : index
    %11 = vector.load %arg5[%c0_7, %c0_8] : memref<20x1xf32, #tpu.memory_space<vmem>>, vector<20x1xf32>
    %12 = vector.broadcast %11 : vector<20x1xf32> to vector<20x512xf32>
    %13 = arith.addf %10, %12 : vector<20x512xf32>
    %14 = math.tanh %13 : vector<20x512xf32>
    %c0_9 = arith.constant 0 : index
    %c0_10 = arith.constant 0 : index
    %15 = vector.load %arg6[%c0_9, %c0_10] : memref<20x20xf32, #tpu.memory_space<vmem>>, vector<20x20xf32>
    %cst_11 = arith.constant dense<0.000000e+00> : vector<20x512xf32>
    %16 = tpu.matmul %15, %14, %cst_11 {dimension_numbers = #tpu.dot_dimension_numbers<[1], [0], [0], [1], [0, 0, 1, 1], [], []>} : vector<20x20xf32>, vector<20x512xf32>, vector<20x512xf32> -> vector<20x512xf32>
    %c0_12 = arith.constant 0 : index
    %c0_13 = arith.constant 0 : index
    %17 = vector.load %arg7[%c0_12, %c0_13] : memref<20x1xf32, #tpu.memory_space<vmem>>, vector<20x1xf32>
    %18 = vector.broadcast %17 : vector<20x1xf32> to vector<20x512xf32>
    %19 = arith.addf %16, %18 : vector<20x512xf32>
    %20 = math.tanh %19 : vector<20x512xf32>
    %c0_14 = arith.constant 0 : index
    %c0_15 = arith.constant 0 : index
    %21 = vector.load %arg8[%c0_14, %c0_15] : memref<20x20xf32, #tpu.memory_space<vmem>>, vector<20x20xf32>
    %cst_16 = arith.constant dense<0.000000e+00> : vector<20x512xf32>
    %22 = tpu.matmul %21, %20, %cst_16 {dimension_numbers = #tpu.dot_dimension_numbers<[1], [0], [0], [1], [0, 0, 1, 1], [], []>} : vector<20x20xf32>, vector<20x512xf32>, vector<20x512xf32> -> vector<20x512xf32>
    %c0_17 = arith.constant 0 : index
    %c0_18 = arith.constant 0 : index
    %23 = vector.load %arg9[%c0_17, %c0_18] : memref<20x1xf32, #tpu.memory_space<vmem>>, vector<20x1xf32>
    %24 = vector.broadcast %23 : vector<20x1xf32> to vector<20x512xf32>
    %25 = arith.addf %22, %24 : vector<20x512xf32>
    %26 = math.tanh %25 : vector<20x512xf32>
    %c0_19 = arith.constant 0 : index
    %c0_20 = arith.constant 0 : index
    %27 = vector.load %arg10[%c0_19, %c0_20] : memref<8x20xf32, #tpu.memory_space<vmem>>, vector<8x20xf32>
    %cst_21 = arith.constant dense<0.000000e+00> : vector<8x512xf32>
    %28 = tpu.matmul %27, %26, %cst_21 {dimension_numbers = #tpu.dot_dimension_numbers<[1], [0], [0], [1], [0, 0, 1, 1], [], []>} : vector<8x20xf32>, vector<20x512xf32>, vector<8x512xf32> -> vector<8x512xf32>
    %c0_22 = arith.constant 0 : index
    %c0_23 = arith.constant 0 : index
    %29 = vector.load %arg11[%c0_22, %c0_23] : memref<8x1xf32, #tpu.memory_space<vmem>>, vector<8x1xf32>
    %30 = vector.broadcast %29 : vector<8x1xf32> to vector<8x512xf32>
    %31 = arith.addf %28, %30 : vector<8x512xf32>
    %c0_24 = arith.constant 0 : index
    %c0_25 = arith.constant 0 : index
    %32 = vector.load %arg12[%c0_24, %c0_25] : memref<8x512xf32, #tpu.memory_space<vmem>>, vector<8x512xf32>
    tpu.vector_store %arg12[%c0_24, %c0_25], %31 {strides = array<i32>} : memref<8x512xf32, #tpu.memory_space<vmem>>, vector<8x512xf32>,
    return
  }
  func.func @transform_0(%arg0: i32) -> (i32, i32) {
    %c0_i32 = arith.constant 0 : i32
    %c0_i32_0 = arith.constant 0 : i32
    return %c0_i32, %arg0 : i32, i32
  }
  func.func @transform_1(%arg0: i32) -> (i32, i32) {
    %c0_i32 = arith.constant 0 : i32
    %c0_i32_0 = arith.constant 0 : i32
    %c0_i32_1 = arith.constant 0 : i32
    return %c0_i32, %c0_i32_0 : i32, i32
  }
  func.func @transform_2(%arg0: i32) -> (i32, i32) {
    %c0_i32 = arith.constant 0 : i32
    %c0_i32_0 = arith.constant 0 : i32
    %c0_i32_1 = arith.constant 0 : i32
    return %c0_i32, %c0_i32_0 : i32, i32
  }
  func.func @transform_3(%arg0: i32) -> (i32, i32) {
    %c0_i32 = arith.constant 0 : i32
    %c0_i32_0 = arith.constant 0 : i32
    %c0_i32_1 = arith.constant 0 : i32
    return %c0_i32, %c0_i32_0 : i32, i32
  }
  func.func @transform_4(%arg0: i32) -> (i32, i32) {
    %c0_i32 = arith.constant 0 : i32
    %c0_i32_0 = arith.constant 0 : i32
    %c0_i32_1 = arith.constant 0 : i32
    return %c0_i32, %c0_i32_0 : i32, i32
  }
  func.func @transform_5(%arg0: i32) -> (i32, i32) {
    %c0_i32 = arith.constant 0 : i32
    %c0_i32_0 = arith.constant 0 : i32
    %c0_i32_1 = arith.constant 0 : i32
    return %c0_i32, %c0_i32_0 : i32, i32
  }
  func.func @transform_6(%arg0: i32) -> (i32, i32) {
    %c0_i32 = arith.constant 0 : i32
    %c0_i32_0 = arith.constant 0 : i32
    %c0_i32_1 = arith.constant 0 : i32
    return %c0_i32, %c0_i32_0 : i32, i32
  }
  func.func @transform_7(%arg0: i32) -> (i32, i32) {
    %c0_i32 = arith.constant 0 : i32
    %c0_i32_0 = arith.constant 0 : i32
    %c0_i32_1 = arith.constant 0 : i32
    return %c0_i32, %c0_i32_0 : i32, i32
  }
  func.func @transform_8(%arg0: i32) -> (i32, i32) {
    %c0_i32 = arith.constant 0 : i32
    %c0_i32_0 = arith.constant 0 : i32
    %c0_i32_1 = arith.constant 0 : i32
    return %c0_i32, %c0_i32_0 : i32, i32
  }
  func.func @transform_9(%arg0: i32) -> (i32, i32) {
    %c0_i32 = arith.constant 0 : i32
    %c0_i32_0 = arith.constant 0 : i32
    %c0_i32_1 = arith.constant 0 : i32
    return %c0_i32, %c0_i32_0 : i32, i32
  }
  func.func @transform_10(%arg0: i32) -> (i32, i32) {
    %c0_i32 = arith.constant 0 : i32
    %c0_i32_0 = arith.constant 0 : i32
    %c0_i32_1 = arith.constant 0 : i32
    return %c0_i32, %c0_i32_0 : i32, i32
  }
  func.func @transform_11(%arg0: i32) -> (i32, i32) {
    %c0_i32 = arith.constant 0 : i32
    %c0_i32_0 = arith.constant 0 : i32
    return %c0_i32, %arg0 : i32, i32
  }
}

</mosaic_0001>

<bundles_post_ra>
// kernel: tpu_custom_call.1
= control target key start
LH: loop header
LB: loop body
LE: loop exit
PB: predicated region body
PF: predicated region fallthrough
CT: control target
= control target key end

     0   :  { %s1959_s0 = inlined_call_operand.vmem [shape: f32[1,1024], index: 0, kind: input, shape index: {}]   ;;  %s1960_s1 = inlined_call_operand.vmem [shape: f32[20,1], index: 1, kind: input, shape index: {}]   ;;  %s1961_s2 = inlined_call_operand.vmem [shape: f32[20,1], index: 2, kind: input, shape index: {}]   ;;  %s1962_s3 = inlined_call_operand.vmem [shape: f32[20,20], index: 3, kind: input, shape index: {}]   ;;  %s1963_s4 = inlined_call_operand.vmem [shape: f32[20,1], index: 4, kind: input, shape index: {}]   ;;  %s1964_s5 = inlined_call_operand.vmem [shape: f32[20,20], index: 5, kind: input, shape index: {}]   ;;  %s1965_s6 = inlined_call_operand.vmem [shape: f32[20,1], index: 6, kind: input, shape index: {}]   ;;  %s1966_s7 = inlined_call_operand.vmem [shape: f32[20,20], index: 7, kind: input, shape index: {}]   ;;  %s1967_s8 = inlined_call_operand.vmem [shape: f32[20,1], index: 8, kind: input, shape index: {}]   ;;  %s1968_s9 = inlined_call_operand.vmem [shape: f32[8,20], index: 9, kind: input, shape index: {}]   ;;  %s1969_s10 = inlined_call_operand.vmem [shape: f32[8,1], index: 10, kind: input, shape index: {}]   ;;  %s1970_s11 = inlined_call_operand.hbm [shape: f32[8,1024], index: 11, kind: output, shape index: {}]  }
   0x1   :  { %1971 = sst [smem:[#allocation5_spill]] %s1959_s0 }
   0x2   :  { %16 = vsyncpa [#allocation3], 0 }
   0x3   :  { %18 = vsyncpa [#allocation3 + $0x1], 0  ;;  %s1726_s17 = smov 0   ;;  %s1728_s18 = smov 0  }
   0x4   :  { %s1730_s19 = smov 0   ;;  %s1732_s20 = smov 0  }
   0x5 LB: > { %s1747_s21 = sadd.s32 4294967295, %s1661_s20   ;;  %s1380_s22 = sadd.s32 4294967294, %s1661_s20   ;;  %s1661_s20 = sphi %s1732_s20, %s1978_s20   ;;  %s1657_s19 = sphi %s1730_s19, %s1977_s19   ;;  %s1653_s18 = sphi %s1728_s18, %s1976_s18   ;;  %s1649_s17 = sphi %s1726_s17, %s1975_s17  }
   0x6   : > { %s1751_s23 = sadd.s32 1, %s1661_s20   ;;  %s267_s24 = sadd.s32 1, %s1657_s19 }
   0x7   : > { %s264_s25 = ssub.s32 %s1661_s20, %s1751_s23  ;;  %p277_p0 = scmp.ne.s32.totalorder %s1657_s19, %s1653_s18 }
   0x8   : > { %p265_p1 = scmp.eq.s32.totalorder %s264_s25, 0  ;;  %p278_p2 = scmp.eq.s32.totalorder %s1747_s21, 1 }
   0x9   : > { %p283_p3 = scmp.ne.s32.totalorder %s1653_s18, %s1649_s17  ;;  %p284_p4 = scmp.eq.s32.totalorder %s1380_s22, 1 }
   0xa   : > { %s1762_s26 = scalar_select %p265_p1, %s1657_s19, %s267_s24  }
   0xb   : > { %p1764_p5 = por %p278_p2, %p277_p0  ;;  %p1768_p6 = por %p284_p4, %p283_p3 }
   0xc   : > { %p1383_p7 = scmp.ge.s32.totalorder %s1661_s20, 1  ;;  %p340_p8 = scmp.lt.s32.totalorder %s1661_s20, 3 }
   0xe   : > { %p341_p9 = pnand %p1383_p7, %p340_p8 }
   0xf   : > { %v437_v0 = vld [vmem:[%s1961_s2] sm:$0xff] (!%p341_p9)  ;;  %v1663_v2 = vmov (!%p341_p9), 0   ;;  %v438_v3 = vld [vmem:[%s1961_s2 + $0x8] sm:$0xff] (!%p341_p9)  ;;  %v439_v5 = vld [vmem:[%s1961_s2 + $0x10] sm:$0xf] (!%p341_p9)  ;;  %v1664_v17 = vmov (!%p341_p9), 0.0   ;;  %v405_v18 = vlaneseq (!%p341_p9) }
  0x10   : > { %344 = sbr.rel (%p341_p9) target bundleno = 1118 (0x45e), region = 64  ;;  %v386_v1 = vld [vmem:[%s1960_s1] sm:$0xff] (!%p341_p9)  ;;  %1502 = vset.pattern.permute.xlu1 (!%p341_p9), %v1663_v2  ;;  %1501 = vset.pattern.permute.xlu0 (!%p341_p9), %v1663_v2  ;;  %v387_v4 = vld [vmem:[%s1960_s1 + $0x8] sm:$0xff] (!%p341_p9)  ;;  %v388_v6 = vld [vmem:[%s1960_s1 + $0x10] sm:$0xf] (!%p341_p9)  ;;  %s1385_s12 = sshll.u32 (!%p341_p9), %s1747_s21, 2 }
  0x11   : > { %442 = vperm.xlu1 (!%p341_p9), %1502, %v437_v0   ;;  %391 = vperm.xlu0 (!%p341_p9), %1501, %v386_v1   ;;  %v483_v7 = vld [vmem:[%s1963_s4 + $0x8] sm:$0xff] (!%p341_p9)  ;;  %v482_v8 = vld [vmem:[%s1963_s4] sm:$0xff] (!%p341_p9)  ;;  %v484_v10 = vld [vmem:[%s1963_s4 + $0x10] sm:$0xf] (!%p341_p9)  ;;  %p380_p10 = scmp.lt.s32.totalorder (!%p341_p9), %s1385_s12, 7  ;;  %v406_v19 = vshrl.u32 (!%p341_p9), %v405_v18, 7 }
  0x12   : > { %v704_v9 = vld [vmem:[%s1965_s6] sm:$0xff] (!%p341_p9)  ;;  %v706_v11 = vld [vmem:[%s1965_s6 + $0x10] sm:$0xf] (!%p341_p9)  ;;  %v705_v12 = vld [vmem:[%s1965_s6 + $0x8] sm:$0xff] (!%p341_p9)  ;;  %587 = vmatprep.mubr.f32.mxu0 (!%p341_p9), %v1664_v17  ;;  %670 = vmatprep.mubr.f32.mxu1 (!%p341_p9), %v1664_v17  ;;  %s1974_s0 = sld [smem:[#allocation5_spill]] (!%p341_p9)  ;;  %vm510_vm0 = vcmask (!%p341_p9), 1043456  }
  0x13   : > { %v925_v13 = vld [vmem:[%s1967_s8 + $0x8] sm:$0xff] (!%p341_p9)  ;;  %v924_v14 = vld [vmem:[%s1967_s8] sm:$0xff] (!%p341_p9)  ;;  %v926_v16 = vld [vmem:[%s1967_s8 + $0x10] sm:$0xf] (!%p341_p9)  ;;  %v407_v20 = vsub.s32 (!%p341_p9), 0, %v406_v19  ;;  %v411_v21 = vsub.s32 (!%p341_p9), 1, %v406_v19 }
  0x14   : > { %v1142_v15 = vld [vmem:[%s1969_s10] sm:$0xff] (!%p341_p9)  ;;  %v415_v22 = vsub.s32 (!%p341_p9), 2, %v406_v19  ;;  %v419_v23 = vsub.s32 (!%p341_p9), 3, %v406_v19  ;;  %vm500_vm1 = vcmask (!%p341_p9), 162816   ;;  %s376_s16 = sand.u32 (!%p341_p9), 1, %s1653_s18   ;;  %s1427_s24 = sshll.u32 (!%p341_p9), %s1747_s21, 9 }
  0x15   : > { %447 = vperm.xlu1 (!%p341_p9), %1502, %v438_v3   ;;  %396 = vperm.xlu0 (!%p341_p9), %1501, %v387_v4   ;;  %s1384_s22 = sshll.u32 (!%p341_p9), %s376_s16, 5  ;;  %s1917_s13 = scalar_lea.hbm (!%p341_p9), %s1970_s11, %s1427_s24 }
  0x16   : > { %s378_s25 = scalar_lea.vmem (!%p341_p9), [#allocation2], %s1384_s22  ;;  %s1310_s21 = scalar_lea.sflag (!%p341_p9), [#allocation3], %s376_s16 }
  0x17   : > { %s1980_s12 = smov (!%p380_p10, %s1385_s12), 7  ;;  %s1324_s29 = sshll.u32 %s378_s25, 4  ;;  %s1919_s29 = int_to_ptr.vmem [resolvable:$true] %s1324_s29 }
  0x18   : > { %s382_s15 = scalar_lea.vmem %s1974_s0, %s1980_s12  ;;  %s1599_s14 = scalar_lea.vmem %s1919_s29, 512 }
  0x19   : > { %452 = vperm.xlu1 %1502, %v439_v5   ;;  %401 = vperm.xlu0 %1501, %v388_v6   ;;  %v385_v24 = vld [vmem:[%s382_s15] sm:$0xf]  ;;  %p1600_p11 = scmp.ne.s32.totalorder %s1919_s29, %s1599_s14  ;;  %s1665_s15 = smov [#allocation2]  }
  0x1a   : > { %v408_v25 = vrot.slane %v385_v24, %v407_v20  ;;  %v412_v26 = vrot.slane %v385_v24, %v411_v21  ;;  %v416_v27 = vrot.slane %v385_v24, %v415_v22  ;;  %v420_v28 = vrot.slane %v385_v24, %v419_v23  ;;  %s1603_s22 = sshll.u32 %s1665_s15, 4  ;;  %s1604_s22 = int_to_ptr.vmem [resolvable:$false] %s1603_s22 }
  0x1b   : > { %p1601_p12 = pnand %p1600_p11, %p1764_p5  ;;  %s1605_s0 = scalar_lea.vmem %s1604_s22, 1024 }
  0x1c   : > { %p1606_p0 = scmp.lt.s32.totalorder %s1919_s29, %s1604_s22  ;;  %p1607_p1 = scmp.lt.s32.totalorder %s1605_s0, %s1599_s14 }
  0x1d   : > { %492 = vperm.xlu1 %1502, %v483_v7   ;;  %487 = vperm.xlu0 %1501, %v482_v8   ;;  %p1602_p13 = pneg %p1601_p12 }
  0x1e   : > { %p1608_p2 = por %p1607_p1, %p1606_p0 }
  0x20   : > { %p1609_p3 = pnand %p1608_p2, %p1602_p13 }
  0x21   : > { %709 = vperm.xlu1 %1502, %v704_v9   ;;  %497 = vperm.xlu0 %1501, %v484_v10   ;;  %v479_v9 = vld [vmem:[%s1962_s3] sm:$0xff] }
  0x25   : > { %719 = vperm.xlu1 %1502, %v706_v11   ;;  %714 = vperm.xlu0 %1501, %v705_v12   ;;  %v480_v12 = vld [vmem:[%s1962_s3 + $0x8] sm:$0xff] }
  0x29   : > { %934 = vperm.xlu1 %1502, %v925_v13   ;;  %929 = vperm.xlu0 %1501, %v924_v14   ;;  %v481_v13 = vld [vmem:[%s1962_s3 + $0x10] sm:$0xf] }
  0x2d   : > { %1145 = vperm.xlu1 %1502, %v1142_v15   ;;  %939 = vperm.xlu0 %1501, %v926_v16  }
  0x90   : > { %v443_v29 = vpop.permute.xlu1 %442  ;;  %v392_v30 = vpop.permute.xlu0 %391 }
  0x91   : > { %v425_v31 = vmul.f32 %v408_v25, %v392_v30  ;;  %v426_v32 = vmul.f32 %v412_v26, %v392_v30  ;;  %v427_v33 = vmul.f32 %v416_v27, %v392_v30  ;;  %v428_v34 = vmul.f32 %v420_v28, %v392_v30 }
  0x93   : > { %v455_v35 = vadd.f32 %v443_v29, %v425_v31  ;;  %v456_v36 = vadd.f32 %v443_v29, %v426_v32  ;;  %v457_v37 = vadd.f32 %v443_v29, %v427_v33  ;;  %v458_v38 = vadd.f32 %v443_v29, %v428_v34 }
  0x94   : > { %v448_v39 = vpop.permute.xlu1 %447  ;;  %v397_v40 = vpop.permute.xlu0 %396 }
  0x95   : > { %1503 = vtanh.f32 %v455_v35  ;;  %v429_v41 = vmul.f32 %v408_v25, %v397_v40  ;;  %v430_v42 = vmul.f32 %v412_v26, %v397_v40  ;;  %v431_v43 = vmul.f32 %v416_v27, %v397_v40 }
  0x96   : > { %1505 = vtanh.f32 %v456_v36  ;;  %v432_v44 = vmul.f32 %v420_v28, %v397_v40 }
  0x97   : > { %1507 = vtanh.f32 %v457_v37  ;;  %v459_v45 = vadd.f32 %v448_v39, %v429_v41  ;;  %v460_v46 = vadd.f32 %v448_v39, %v430_v42  ;;  %v461_v47 = vadd.f32 %v448_v39, %v431_v43 }
  0x98   : > { %1509 = vtanh.f32 %v458_v38  ;;  %v462_v48 = vadd.f32 %v448_v39, %v432_v44  ;;  %v402_v49 = vpop.permute.xlu0 %401  ;;  %v453_v52 = vpop.permute.xlu1 %452 }
  0x99   : > { %1511 = vtanh.f32 %v459_v45  ;;  %v433_v50 = vmul.f32 %v408_v25, %v402_v49  ;;  %v434_v51 = vmul.f32 %v412_v26, %v402_v49  ;;  %v436_v53 = vmul.f32 %v420_v28, %v402_v49 }
  0x9a   : > { %1513 = vtanh.f32 %v460_v46  ;;  %v435_v54 = vmul.f32 %v416_v27, %v402_v49 }
  0x9b   : > { %1515 = vtanh.f32 %v461_v47  ;;  %v464_v55 = vadd.f32 %v453_v52, %v434_v51  ;;  %v466_v56 = vadd.f32 %v453_v52, %v436_v53  ;;  %v463_v57 = vadd.f32 %v453_v52, %v433_v50 }
  0x9c   : > { %1517 = vtanh.f32 %v462_v48  ;;  %v465_v59 = vadd.f32 %v453_v52, %v435_v54  ;;  %v488_v14 = vpop.permute.xlu0 %487  ;;  %v493_v23 = vpop.permute.xlu1 %492 }
  0x9d   : > { %1519 = vtanh.f32 %v464_v55 }
  0x9e   : > { %1521 = vtanh.f32 %v466_v56  ;;  %v701_v56 = vld [vmem:[%s1964_s5] sm:$0xff] }
  0x9f   : > { %v1504_v58 = vpop.eup %1503  ;;  %1523 = vtanh.f32 %v463_v57 }
  0xa0   : > { %v1506_v60 = vpop.eup %1505  ;;  %1525 = vtanh.f32 %v465_v59  ;;  %v498_v34 = vpop.permute.xlu0 %497  ;;  %v702_v59 = vld [vmem:[%s1964_s5 + $0x8] sm:$0xff] }
  0xa1   : > { %v1508_v61 = vpop.eup %1507 }
  0xa2   : > { %v1510_v62 = vpop.eup %1509 }
  0xa3   : > { %v1512_v63 = vpop.eup %1511 }
  0xa4   : > { %v1514_v0 = vpop.eup %1513  ;;  %v1430_v1 = vpack.c.bf16 %v1512_v63, %v1504_v58 }
  0xa5   : > { %v1516_v2 = vpop.eup %1515  ;;  %v1428_v3 = vpack.c.bf16 %v1514_v0, %v1506_v60  ;;  %v703_v60 = vld [vmem:[%s1964_s5 + $0x10] sm:$0xf] }
  0xa6   : > { %v1518_v4 = vpop.eup %1517  ;;  %v1434_v5 = vpack.c.bf16 %v1516_v2, %v1508_v61  ;;  %v710_v61 = vpop.permute.xlu1 %709 }
  0xa7   : > { %1429 = vmatprep.subr.bf16.mxu0 %v1428_v3  ;;  %v1432_v6 = vpack.c.bf16 %v1518_v4, %v1510_v62  ;;  %v1520_v7 = vpop.eup %1519 }
  0xa8   : > { %1431 = vmatpush1.bf16.msra.mxu0 %v1430_v1  ;;  %v1522_v8 = vpop.eup %1521 }
  0xa9   : > { %1433 = vmatprep.subr.bf16.mxu1 %v1432_v6  ;;  %1386 = vmatprep.subr.msk.mxu0 %vm510_vm0, %v1520_v7  ;;  %v1524_v10 = vpop.eup %1523 }
  0xaa   : > { %1435 = vmatpush1.bf16.msra.mxu1 %v1434_v5  ;;  %v1526_v11 = vpop.eup %1525  ;;  %v715_v5 = vpop.permute.xlu0 %714 }
  0xab   : > { %1391 = vmatprep.subr.msk.mxu1 %vm510_vm0, %v1522_v8 }
  0xac   : > { %1387 = vmatpush1.msk.msra.mxu0 %vm510_vm0, %v1524_v10 }
  0xad   : > { %1388 = vmatmul.mubr.msk.f32.vlgmr.msra.gmra.mrb[0].mxu0 %vm500_vm1, %v479_v9 }
  0xae   : > { %1392 = vmatpush1.msk.msra.mxu1 %vm510_vm0, %v1526_v11  ;;  %593 = vmatprep.mubr.f32.mxu0 %v1664_v17 }
  0xaf   : > { %1393 = vmatmul.mubr.msk.f32.vlgmr.msra.gmra.mrb[0].mxu1 %vm500_vm1, %v479_v9 }
  0xb0   : > { %676 = vmatprep.mubr.f32.mxu1 %v1664_v17 }
  0xb1   : > { %1389 = vmatmul.mubr.msk.f32.gmra.mrb[2].mxu0 %vm500_vm1, %v480_v12 }
  0xb2   : > { %599 = vmatprep.mubr.f32.mxu0 %v1664_v17 }
  0xb3   : > { %1394 = vmatmul.mubr.msk.f32.gmra.mrb[2].mxu1 %vm500_vm1, %v480_v12 }
  0xb4   : > { %682 = vmatprep.mubr.f32.mxu1 %v1664_v17 }
  0xb5   : > { %1390 = vmatmul.mubr.msk.f32.gmra.mrb[4].mxu0 %vm500_vm1, %v481_v13 }
  0xb6   : > { %807 = vmatprep.mubr.f32.mxu0 %v1664_v17 }
  0xb7   : > { %1395 = vmatmul.mubr.msk.f32.gmra.mrb[4].mxu1 %vm500_vm1, %v481_v13 }
  0xb8   : > { %890 = vmatprep.mubr.f32.mxu1 %v1664_v17 }
 0x180   : > { %v589_v15 = vpop.f32.mrb[0].mxu0 }
 0x181   : > { %v590_v16 = vadd.f32 %v589_v15, %v488_v14  ;;  %v591_v18 = vpop.f32.mrb[1].mxu0 }
 0x182   : > { %v672_v19 = vpop.f32.mrb[0].mxu1  ;;  %v592_v20 = vadd.f32 %v591_v18, %v488_v14 }
 0x183   : > { %1527 = vtanh.f32 %v590_v16  ;;  %v673_v21 = vadd.f32 %v672_v19, %v488_v14  ;;  %v674_v22 = vpop.f32.mrb[1].mxu1  ;;  %v720_v16 = vpop.permute.xlu1 %719 }
 0x184   : > { %1529 = vtanh.f32 %v592_v20  ;;  %v675_v24 = vadd.f32 %v674_v22, %v488_v14  ;;  %v595_v25 = vpop.f32.mrb[2].mxu0 }
 0x185   : > { %1531 = vtanh.f32 %v673_v21  ;;  %v596_v26 = vadd.f32 %v595_v25, %v493_v23  ;;  %v597_v27 = vpop.f32.mrb[3].mxu0 }
 0x186   : > { %1533 = vtanh.f32 %v675_v24  ;;  %v678_v28 = vpop.f32.mrb[2].mxu1  ;;  %v598_v29 = vadd.f32 %v597_v27, %v493_v23 }
 0x187   : > { %1535 = vtanh.f32 %v596_v26  ;;  %v679_v30 = vadd.f32 %v678_v28, %v493_v23  ;;  %v680_v31 = vpop.f32.mrb[3].mxu1 }
 0x188   : > { %1537 = vtanh.f32 %v598_v29  ;;  %v681_v32 = vadd.f32 %v680_v31, %v493_v23  ;;  %v601_v33 = vpop.f32.mrb[4].mxu0 }
 0x189   : > { %1539 = vtanh.f32 %v679_v30  ;;  %v603_v35 = vpop.f32.mrb[5].mxu0  ;;  %v602_v38 = vadd.f32 %v601_v33, %v498_v34 }
 0x18a   : > { %1541 = vtanh.f32 %v681_v32  ;;  %v684_v36 = vpop.f32.mrb[4].mxu1  ;;  %v604_v37 = vadd.f32 %v603_v35, %v498_v34 }
 0x18b   : > { %v686_v39 = vpop.f32.mrb[5].mxu1  ;;  %v685_v42 = vadd.f32 %v684_v36, %v498_v34 }
 0x18c   : > { %1543 = vtanh.f32 %v604_v37  ;;  %v687_v40 = vadd.f32 %v686_v39, %v498_v34  ;;  %v921_v39 = vld [vmem:[%s1966_s7] sm:$0xff] }
 0x18d   : > { %v1528_v41 = vpop.eup %1527 }
 0x18e   : > { %v1530_v43 = vpop.eup %1529  ;;  %1545 = vtanh.f32 %v687_v40 }
 0x18f   : > { %v1532_v44 = vpop.eup %1531  ;;  %1547 = vtanh.f32 %v602_v38 }
 0x190   : > { %v1534_v45 = vpop.eup %1533  ;;  %1549 = vtanh.f32 %v685_v42  ;;  %v922_v42 = vld [vmem:[%s1966_s7 + $0x8] sm:$0xff] }
 0x191   : > { %v1536_v46 = vpop.eup %1535 }
 0x192   : > { %v1538_v47 = vpop.eup %1537  ;;  %v1438_v48 = vpack.c.bf16 %v1536_v46, %v1528_v41 }
 0x193   : > { %v1540_v49 = vpop.eup %1539  ;;  %v1436_v50 = vpack.c.bf16 %v1538_v47, %v1530_v43  ;;  %v923_v43 = vld [vmem:[%s1966_s7 + $0x10] sm:$0xf] }
 0x194   : > { %v1542_v51 = vpop.eup %1541  ;;  %v1442_v52 = vpack.c.bf16 %v1540_v49, %v1532_v44  ;;  %v930_v44 = vpop.permute.xlu0 %929 }
 0x195   : > { %1437 = vmatprep.subr.bf16.mxu0 %v1436_v50  ;;  %v1440_v53 = vpack.c.bf16 %v1542_v51, %v1534_v45 }
 0x196   : > { %v1544_v54 = vpop.eup %1543  ;;  %1439 = vmatpush1.bf16.msra.mxu0 %v1438_v48 }
 0x197   : > { %1441 = vmatprep.subr.bf16.mxu1 %v1440_v53  ;;  %1396 = vmatprep.subr.msk.mxu0 %vm510_vm0, %v1544_v54 }
 0x198   : > { %v1546_v55 = vpop.eup %1545  ;;  %1443 = vmatpush1.bf16.msra.mxu1 %v1442_v52  ;;  %v935_v52 = vpop.permute.xlu1 %934 }
 0x199   : > { %v1548_v57 = vpop.eup %1547  ;;  %1401 = vmatprep.subr.msk.mxu1 %vm510_vm0, %v1546_v55 }
 0x19a   : > { %1397 = vmatpush1.msk.msra.mxu0 %vm510_vm0, %v1548_v57  ;;  %v1550_v58 = vpop.eup %1549 }
 0x19b   : > { %1398 = vmatmul.mubr.msk.f32.vlgmr.msra.gmra.mrb[6].mxu0 %vm500_vm1, %v701_v56 }
 0x19c   : > { %1402 = vmatpush1.msk.msra.mxu1 %vm510_vm0, %v1550_v58  ;;  %813 = vmatprep.mubr.f32.mxu0 %v1664_v17 }
 0x19d   : > { %1403 = vmatmul.mubr.msk.f32.vlgmr.msra.gmra.mrb[6].mxu1 %vm500_vm1, %v701_v56 }
 0x19e   : > { %896 = vmatprep.mubr.f32.mxu1 %v1664_v17 }
 0x19f   : > { %1399 = vmatmul.mubr.msk.f32.gmra.mrb[8].mxu0 %vm500_vm1, %v702_v59 }
 0x1a0   : > { %819 = vmatprep.mubr.f32.mxu0 %v1664_v17 }
 0x1a1   : > { %1404 = vmatmul.mubr.msk.f32.gmra.mrb[8].mxu1 %vm500_vm1, %v702_v59 }
 0x1a2   : > { %902 = vmatprep.mubr.f32.mxu1 %v1664_v17 }
 0x1a3   : > { %1400 = vmatmul.mubr.msk.f32.gmra.mrb[10].mxu0 %vm500_vm1, %v703_v60 }
 0x1a4   : > { %1027 = vmatprep.mubr.f32.mxu0 %v1664_v17 }
 0x1a5   : > { %1405 = vmatmul.mubr.msk.f32.gmra.mrb[10].mxu1 %vm500_vm1, %v703_v60 }
 0x1a6   : > { %1110 = vmatprep.mubr.f32.mxu1 %v1664_v17 }
 0x26e   : > { %v809_v62 = vpop.f32.mrb[6].mxu0 }
 0x26f   : > { %v810_v63 = vadd.f32 %v809_v62, %v710_v61  ;;  %v811_v0 = vpop.f32.mrb[7].mxu0  ;;  %v940_v62 = vpop.permute.xlu0 %939 }
 0x270   : > { %v892_v1 = vpop.f32.mrb[6].mxu1  ;;  %v812_v2 = vadd.f32 %v811_v0, %v710_v61 }
 0x271   : > { %1551 = vtanh.f32 %v810_v63  ;;  %v893_v3 = vadd.f32 %v892_v1, %v710_v61  ;;  %v894_v4 = vpop.f32.mrb[7].mxu1 }
 0x272   : > { %1553 = vtanh.f32 %v812_v2  ;;  %v895_v6 = vadd.f32 %v894_v4, %v710_v61  ;;  %v815_v7 = vpop.f32.mrb[8].mxu0 }
 0x273   : > { %1555 = vtanh.f32 %v893_v3  ;;  %v816_v8 = vadd.f32 %v815_v7, %v715_v5  ;;  %v817_v9 = vpop.f32.mrb[9].mxu0 }
 0x274   : > { %1557 = vtanh.f32 %v895_v6  ;;  %v898_v10 = vpop.f32.mrb[8].mxu1  ;;  %v818_v11 = vadd.f32 %v817_v9, %v715_v5 }
 0x275   : > { %1559 = vtanh.f32 %v816_v8  ;;  %v899_v12 = vadd.f32 %v898_v10, %v715_v5  ;;  %v900_v13 = vpop.f32.mrb[9].mxu1 }
 0x276   : > { %1561 = vtanh.f32 %v818_v11  ;;  %v901_v14 = vadd.f32 %v900_v13, %v715_v5  ;;  %v821_v15 = vpop.f32.mrb[10].mxu0 }
 0x277   : > { %1563 = vtanh.f32 %v899_v12  ;;  %v823_v18 = vpop.f32.mrb[11].mxu0  ;;  %v822_v21 = vadd.f32 %v821_v15, %v720_v16 }
 0x278   : > { %1565 = vtanh.f32 %v901_v14  ;;  %v904_v19 = vpop.f32.mrb[10].mxu1  ;;  %v824_v20 = vadd.f32 %v823_v18, %v720_v16 }
 0x279   : > { %v906_v22 = vpop.f32.mrb[11].mxu1  ;;  %v905_v25 = vadd.f32 %v904_v19, %v720_v16 }
 0x27a   : > { %1567 = vtanh.f32 %v824_v20  ;;  %v907_v23 = vadd.f32 %v906_v22, %v720_v16 }
 0x27b   : > { %v1552_v24 = vpop.eup %1551 }
 0x27c   : > { %v1554_v26 = vpop.eup %1553  ;;  %1569 = vtanh.f32 %v907_v23 }
 0x27d   : > { %v1556_v27 = vpop.eup %1555  ;;  %1571 = vtanh.f32 %v822_v21  ;;  %v1141_v21 = vld [vmem:[%s1968_s9] sm:$0xff] }
 0x27e   : > { %v1558_v28 = vpop.eup %1557  ;;  %1573 = vtanh.f32 %v905_v25 }
 0x27f   : > { %v1560_v29 = vpop.eup %1559 }
 0x280   : > { %v1562_v30 = vpop.eup %1561  ;;  %v1446_v31 = vpack.c.bf16 %v1560_v29, %v1552_v24  ;;  %v1146_v24 = vpop.permute.xlu1 %1145 }
 0x281   : > { %v1564_v32 = vpop.eup %1563  ;;  %v1444_v33 = vpack.c.bf16 %v1562_v30, %v1554_v26 }
 0x282   : > { %v1566_v34 = vpop.eup %1565  ;;  %v1450_v35 = vpack.c.bf16 %v1564_v32, %v1556_v27 }
 0x283   : > { %1445 = vmatprep.subr.bf16.mxu0 %v1444_v33  ;;  %v1448_v36 = vpack.c.bf16 %v1566_v34, %v1558_v28 }
 0x284   : > { %v1568_v37 = vpop.eup %1567  ;;  %1447 = vmatpush1.bf16.msra.mxu0 %v1446_v31 }
 0x285   : > { %1449 = vmatprep.subr.bf16.mxu1 %v1448_v36  ;;  %1406 = vmatprep.subr.msk.mxu0 %vm510_vm0, %v1568_v37 }
 0x286   : > { %v1570_v38 = vpop.eup %1569  ;;  %1451 = vmatpush1.bf16.msra.mxu1 %v1450_v35 }
 0x287   : > { %v1572_v40 = vpop.eup %1571  ;;  %1411 = vmatprep.subr.msk.mxu1 %vm510_vm0, %v1570_v38 }
 0x288   : > { %1407 = vmatpush1.msk.msra.mxu0 %vm510_vm0, %v1572_v40  ;;  %v1574_v41 = vpop.eup %1573 }
 0x289   : > { %1408 = vmatmul.mubr.msk.f32.vlgmr.msra.gmra.mrb[12].mxu0 %vm500_vm1, %v921_v39 }
 0x28a   : > { %1412 = vmatpush1.msk.msra.mxu1 %vm510_vm0, %v1574_v41  ;;  %1033 = vmatprep.mubr.f32.mxu0 %v1664_v17 }
 0x28b   : > { %1413 = vmatmul.mubr.msk.f32.vlgmr.msra.gmra.mrb[12].mxu1 %vm500_vm1, %v921_v39 }
 0x28c   : > { %1116 = vmatprep.mubr.f32.mxu1 %v1664_v17 }
 0x28d   : > { %1409 = vmatmul.mubr.msk.f32.gmra.mrb[14].mxu0 %vm500_vm1, %v922_v42 }
 0x28e   : > { %1039 = vmatprep.mubr.f32.mxu0 %v1664_v17 }
 0x28f   : > { %1414 = vmatmul.mubr.msk.f32.gmra.mrb[14].mxu1 %vm500_vm1, %v922_v42 }
 0x290   : > { %1122 = vmatprep.mubr.f32.mxu1 %v1664_v17 }
 0x291   : > { %1410 = vmatmul.mubr.msk.f32.gmra.mrb[16].mxu0 %vm500_vm1, %v923_v43 }
 0x292   : > { %1227 = vmatprep.mubr.f32.mxu0 %v1664_v17 }
 0x293   : > { %1415 = vmatmul.mubr.msk.f32.gmra.mrb[16].mxu1 %vm500_vm1, %v923_v43 }
 0x294   : > { %1298 = vmatprep.mubr.f32.mxu1 %v1664_v17 }
 0x35c   : > { %v1029_v45 = vpop.f32.mrb[12].mxu0 }
 0x35d   : > { %v1030_v46 = vadd.f32 %v1029_v45, %v930_v44  ;;  %v1031_v47 = vpop.f32.mrb[13].mxu0 }
 0x35e   : > { %v1112_v48 = vpop.f32.mrb[12].mxu1  ;;  %v1032_v49 = vadd.f32 %v1031_v47, %v930_v44 }
 0x35f   : > { %1575 = vtanh.f32 %v1030_v46  ;;  %v1113_v50 = vadd.f32 %v1112_v48, %v930_v44  ;;  %v1114_v51 = vpop.f32.mrb[13].mxu1 }
 0x360   : > { %1577 = vtanh.f32 %v1032_v49  ;;  %v1115_v53 = vadd.f32 %v1114_v51, %v930_v44  ;;  %v1035_v54 = vpop.f32.mrb[14].mxu0 }
 0x361   : > { %1579 = vtanh.f32 %v1113_v50  ;;  %v1036_v55 = vadd.f32 %v1035_v54, %v935_v52  ;;  %v1037_v56 = vpop.f32.mrb[15].mxu0 }
 0x362   : > { %1581 = vtanh.f32 %v1115_v53  ;;  %v1118_v57 = vpop.f32.mrb[14].mxu1  ;;  %v1038_v58 = vadd.f32 %v1037_v56, %v935_v52 }
 0x363   : > { %1583 = vtanh.f32 %v1036_v55  ;;  %v1119_v17 = vadd.f32 %v1118_v57, %v935_v52  ;;  %v1120_v59 = vpop.f32.mrb[15].mxu1 }
 0x364   : > { %1585 = vtanh.f32 %v1038_v58  ;;  %v1121_v60 = vadd.f32 %v1120_v59, %v935_v52  ;;  %v1041_v61 = vpop.f32.mrb[16].mxu0 }
 0x365   : > { %1587 = vtanh.f32 %v1119_v17  ;;  %v1043_v63 = vpop.f32.mrb[17].mxu0  ;;  %v1042_v2 = vadd.f32 %v1041_v61, %v940_v62 }
 0x366   : > { %1589 = vtanh.f32 %v1121_v60  ;;  %v1124_v0 = vpop.f32.mrb[16].mxu1  ;;  %v1044_v1 = vadd.f32 %v1043_v63, %v940_v62 }
 0x367   : > { %v1126_v3 = vpop.f32.mrb[17].mxu1  ;;  %v1125_v6 = vadd.f32 %v1124_v0, %v940_v62 }
 0x368   : > { %1591 = vtanh.f32 %v1044_v1  ;;  %v1127_v4 = vadd.f32 %v1126_v3, %v940_v62 }
 0x369   : > { %v1576_v5 = vpop.eup %1575 }
 0x36a   : > { %v1578_v7 = vpop.eup %1577  ;;  %1593 = vtanh.f32 %v1127_v4 }
 0x36b   : > { %v1580_v8 = vpop.eup %1579  ;;  %1595 = vtanh.f32 %v1042_v2 }
 0x36c   : > { %v1582_v9 = vpop.eup %1581  ;;  %1597 = vtanh.f32 %v1125_v6 }
 0x36d   : > { %v1584_v10 = vpop.eup %1583 }
 0x36e   : > { %v1586_v11 = vpop.eup %1585  ;;  %v1454_v12 = vpack.c.bf16 %v1584_v10, %v1576_v5 }
 0x36f   : > { %v1588_v13 = vpop.eup %1587  ;;  %v1452_v14 = vpack.c.bf16 %v1586_v11, %v1578_v7 }
 0x370   : > { %v1590_v15 = vpop.eup %1589  ;;  %v1458_v16 = vpack.c.bf16 %v1588_v13, %v1580_v8 }
 0x371   : > { %1453 = vmatprep.subr.bf16.mxu0 %v1452_v14  ;;  %v1456_v18 = vpack.c.bf16 %v1590_v15, %v1582_v9 }
 0x372   : > { %v1592_v19 = vpop.eup %1591  ;;  %1455 = vmatpush1.bf16.msra.mxu0 %v1454_v12 }
 0x373   : > { %1457 = vmatprep.subr.bf16.mxu1 %v1456_v18  ;;  %1416 = vmatprep.subr.msk.mxu0 %vm510_vm0, %v1592_v19 }
 0x374   : > { %v1594_v20 = vpop.eup %1593  ;;  %1459 = vmatpush1.bf16.msra.mxu1 %v1458_v16 }
 0x375   : > { %v1596_v22 = vpop.eup %1595  ;;  %1419 = vmatprep.subr.msk.mxu1 %vm510_vm0, %v1594_v20 }
 0x376   : > { %1417 = vmatpush1.msk.msra.mxu0 %vm510_vm0, %v1596_v22  ;;  %v1598_v23 = vpop.eup %1597 }
 0x377   : > { %1418 = vmatmul.mubr.msk.f32.vlgmr.msra.gmra.mrb[18].mxu0 %vm500_vm1, %v1141_v21 }
 0x378   : > { %1420 = vmatpush1.msk.msra.mxu1 %vm510_vm0, %v1598_v23 }
 0x379   : > { %1421 = vmatmul.mubr.msk.f32.vlgmr.msra.gmra.mrb[18].mxu1 %vm500_vm1, %v1141_v21 }
 0x44a   : > { %v1229_v25 = vpop.f32.mrb[18].mxu0 }
 0x44b   : > { %v1230_v26 = vadd.f32 %v1229_v25, %v1146_v24  ;;  %v1231_v27 = vpop.f32.mrb[19].mxu0 }
 0x44c   : > { %v1300_v28 = vpop.f32.mrb[18].mxu1  ;;  %v1232_v29 = vadd.f32 %v1231_v27, %v1146_v24 }
 0x44d   : > { %1305 = vst [vmem:[%s378_s25] sm:$0xff] %v1230_v26  ;;  %v1301_v30 = vadd.f32 %v1300_v28, %v1146_v24  ;;  %v1302_v31 = vpop.f32.mrb[19].mxu1 }
 0x44e   : > { %1306 = vst [vmem:[%s378_s25 + $0x8] sm:$0xff] %v1232_v29  ;;  %v1303_v32 = vadd.f32 %v1302_v31, %v1146_v24 }
 0x44f   : > { %1307 = vst [vmem:[%s378_s25 + $0x10] sm:$0xff] %v1301_v30 }
 0x450   : > { %1308 = vst [vmem:[%s378_s25 + $0x18] sm:$0xff] %v1303_v32 }
 0x451   : > { %1612 = shalt.err (!%p1609_p3)
}
 0x452   : > { %s1613_s16 = scalar_lea.hbm %s1917_s13, 512  ;;  %s1617_s30 = scalar_lea.hbm %s1970_s11, 1024 }
 0x453   : > { %p1614_p4 = scmp.ne.s32.totalorder %s1917_s13, %s1613_s16  ;;  %p1618_p9 = scmp.lt.u32.totalorder %s1917_s13, %s1970_s11 }
 0x454   : > { %p1619_p10 = scmp.lt.u32.totalorder %s1617_s30, %s1613_s16  ;;  %p1621_p12 = scmp.lt.u32.totalorder %s1613_s16, %s1917_s13 }
 0x455   : > { %p1615_p7 = pnand %p1614_p4, %p1764_p5 }
 0x456   : > { %p1620_p11 = por %p1619_p10, %p1618_p9 }
 0x457   : > { %p1616_p8 = pneg %p1615_p7 }
 0x458   : > { %p1622_p13 = por %p1621_p12, %p1620_p11 }
 0x45a   : > { %p1623_p0 = pnand %p1622_p13, %p1616_p8 }
 0x45c   : > { %1626 = shalt.err (!%p1623_p0)
}
 0x45d   : > { %1460 = dma.vmem_to_hbm [thread:$0]  (%p1764_p5), %s1919_s29, 512, %s1917_s13, %s1310_s21  }
 0x45e PF: > { %p1466_p1 = scmp.ge.s32.totalorder %s1661_s20, 2  ;;  %s1336_s0 = sand.u32 1, %s1649_s17  }
 0x45f   : > { %s1337_s14 = scalar_lea.sflag [#allocation3], %s1336_s0 }
 0x460   : > { %p1463_p2 = pnand %p1466_p1, %p1768_p6 }
 0x462   : > { %1644 = dma.done.wait (!%p1463_p2), %s1337_s14, 512  }
 0x463   : > { %1646 = vsyncadd (!%p1463_p2), %s1337_s14, 4294966784  ;;  %p21_p3 = scmp.ge.s32.totalorder %s1751_s23, 4   ;;  %s1975_s17 = smov %s1653_s18 }
 0x464   : > { %s1976_s18 = smov %s1657_s19  ;;  %s1977_s19 = smov %s1762_s26 }
 0x465   : > { %s1978_s20 = smov %s1751_s23  ;;  %23 = sbr.rel (!%p21_p3) target bundleno = 5 (0x5), region = 99 }
 0x46c   :  { %1342 = vsyncpa [#allocation3], 1 }
 0x46d   :  { %1344 = vsyncpa [#allocation3 + $0x1], 1 }

</bundles_post_ra>
